<compile_context>
chip_gen: v6e
topology: v6e:2x2x1
jax: 0.10.0
libtpu: 0.0.40
codegen_flags: <defaults>
</compile_context>

<pallas_src>
import functools
import math

import jax
import jax.numpy as jnp
from jax import lax
from jax.experimental import pallas as pl
from jax.experimental.pallas import tpu as pltpu


def _round_up(x: int, m: int) -> int:
    return ((x + m - 1) // m) * m


def _round_down_to(x: int, m: int) -> int:
    return max((x // m) * m, m)


def _sublane_multiple(dtype) -> int:
    itemsize = jnp.dtype(dtype).itemsize
    if itemsize >= 4:
        return 8
    if itemsize == 2:
        return 16
    return 32


def _max_identity(dtype):
    dtype = jnp.dtype(dtype)
    if jnp.issubdtype(dtype, jnp.floating):
        return dtype.type(-jnp.inf)
    if jnp.issubdtype(dtype, jnp.integer):
        return dtype.type(jnp.iinfo(dtype).min)
    # TODO(synk): bool (packed i1) max-reduce is untested on Mosaic; cast to int32 upstream.
    raise ValueError(f"unsupported dtype for Pallas max reduce: {dtype}")


@functools.lru_cache(maxsize=None)
def _vmem_budgets():
    """(per_input_buffer_budget_bytes, vmem_limit_bytes), chosen per TPU generation."""
    vmem_phys = None
    try:
        info = pltpu.get_tpu_info()
        vmem_phys = getattr(info, "vmem_capacity_bytes", None)
    except Exception:
        vmem_phys = None
    if vmem_phys is not None and vmem_phys >= 96 * 1024 * 1024:
        # v5e / v6e: 128 MiB physical VMEM -> larger blocks, explicit (load-bearing
        # on v5e, whose scoped default is only 16 MiB) but generous limit.
        return 24 * 1024 * 1024, 80 * 1024 * 1024
    # v7x (64 MiB physical VMEM) or unknown chip: stay conservative so 2x input
    # buffers + padded output + compiler scratch always fit.
    return 16 * 1024 * 1024, 48 * 1024 * 1024


def _pick_row_tile(rows: int, r_cap_rows: int, sub: int) -> int:
    """Row tile: multiple of `sub` (or the full extent), <= cap, and split into >=2
    blocks when possible so both v7x TensorCores get work on the parallel axis."""
    r_cap = max(sub, (r_cap_rows // sub) * sub)
    if rows <= r_cap:
        if rows > sub:
            return min(r_cap, _round_up(pl.cdiv(rows, 2), sub))
        return rows
    return r_cap


# --------------------------------------------------------------------------------------
# Kernel 1: reduce the trailing (lane) axis of a (rows, L) array.  Output (rows, 1).
# Grid = (row_blocks, L_blocks); L is the last ("arbitrary") axis; the output block is
# revisited across it and acts as the running-max accumulator.
# --------------------------------------------------------------------------------------
def _max_last_axis_kernel(x_ref, o_ref, *, l_rem, single_step, neg):
    if single_step:
        o_ref[...] = jnp.max(x_ref[...], axis=1, keepdims=True)
        return

    li = pl.program_id(1)
    n_l = pl.num_programs(1)

    @pl.when(li == 0)
    def _init():
        o_ref[...] = jnp.full(o_ref.shape, neg, o_ref.dtype)

    def _acc(x):
        o_ref[...] = jnp.maximum(o_ref[...], jnp.max(x, axis=1, keepdims=True))

    if l_rem == 0:
        _acc(x_ref[...])
    else:
        # Unmasked fast path for interior tiles; only the final partial tile pays for
        # the iota/compare/select so stale VMEM lanes can never win the max.
        @pl.when(li < n_l - 1)
        def _interior():
            _acc(x_ref[...])

        @pl.when(li == n_l - 1)
        def _tail():
            x = x_ref[...]
            lane = lax.broadcasted_iota(jnp.int32, x.shape, 1)
            _acc(jnp.where(lane < l_rem, x, neg))


def _max_reduce_last_axis(x2: jax.Array, in_budget: int, vmem_limit: int) -> jax.Array:
    rows, length = x2.shape
    itemsize = jnp.dtype(x2.dtype).itemsize
    sub = _sublane_multiple(x2.dtype)
    neg = _max_identity(x2.dtype)

    l_pad_full = _round_up(length, 128)
    # Per block-row bytes = lane-padded input row + lane-padded (r,1) output accumulator
    # (each double-buffered); `in_budget` is the per-pipeline-buffer allowance.
    if sub * itemsize * (l_pad_full + 128) <= in_budget:
        # Whole reduced axis in one step; rows tiled as large as the budget allows.
        l_tile = length
        r_cap_rows = in_budget // (itemsize * (l_pad_full + 128))
        r_tile = _pick_row_tile(rows, r_cap_rows, sub)
    else:
        # Reduced axis must be tiled: minimal row tile, lane tile fills the budget
        # (joint sizing -> contiguous multi-MiB strips per DMA).
        r_tile = rows if rows <= sub else sub
        r_pad = _round_up(r_tile, sub)
        l_tile = _round_down_to(in_budget // (r_pad * itemsize) - 128, 128)
        if l_tile >= length:
            l_tile = length

    l_blocks = pl.cdiv(length, l_tile)
    grid = (pl.cdiv(rows, r_tile), l_blocks)
    kernel = functools.partial(
        _max_last_axis_kernel,
        l_rem=length % l_tile,
        single_step=(l_blocks == 1),
        neg=neg,
    )

    out = pl.pallas_call(
        kernel,
        out_shape=jax.ShapeDtypeStruct((rows, 1), x2.dtype),
        grid=grid,
        in_specs=[pl.BlockSpec((r_tile, l_tile), lambda i, k: (i, k))],
        out_specs=pl.BlockSpec((r_tile, 1), lambda i, k: (i, 0)),
        compiler_params=pltpu.CompilerParams(
            dimension_semantics=("parallel", "arbitrary"),
            vmem_limit_bytes=vmem_limit,
        ),
    )(x2)
    return out[:, 0]


# --------------------------------------------------------------------------------------
# Kernel 2: reduce the middle axis of a (pre, red, post) array (no transpose needed).
# Sublane-axis reduce; output block (1, post_tile) is lane-dense.  Output (pre, 1, post).
# --------------------------------------------------------------------------------------
def _max_middle_axis_kernel(x_ref, o_ref, *, red_rem, single_step, neg):
    if single_step:
        o_ref[...] = jnp.max(x_ref[...], axis=0, keepdims=True)
        return

    ri = pl.program_id(2)
    n_r = pl.num_programs(2)

    @pl.when(ri == 0)
    def _init():
        o_ref[...] = jnp.full(o_ref.shape, neg, o_ref.dtype)

    def _acc(x):
        o_ref[...] = jnp.maximum(o_ref[...], jnp.max(x, axis=0, keepdims=True))

    if red_rem == 0:
        _acc(x_ref[...])
    else:
        @pl.when(ri < n_r - 1)
        def _interior():
            _acc(x_ref[...])

        @pl.when(ri == n_r - 1)
        def _tail():
            x = x_ref[...]
            sl = lax.broadcasted_iota(jnp.int32, x.shape, 0)
            _acc(jnp.where(sl < red_rem, x, neg))


def _max_reduce_middle_axis(x3: jax.Array, in_budget: int, vmem_limit: int) -> jax.Array:
    pre, red, post = x3.shape
    itemsize = jnp.dtype(x3.dtype).itemsize
    sub = _sublane_multiple(x3.dtype)
    neg = _max_identity(x3.dtype)

    post_pad_full = _round_up(post, 128)
    if itemsize * post_pad_full * 2 * sub <= in_budget:
        # Full post extent per block (lane-dense output slab).
        post_tile = post
        if pre == 1 and post > 128:
            # Ensure >= 2 blocks on a parallel axis so both v7x TensorCores get work.
            post_tile = min(post, _round_up(pl.cdiv(post, 2), 128))
        post_pad = _round_up(post_tile, 128)
        red_cap = in_budget // (post_pad * itemsize) - sub
        red_cap = max(sub, _round_down_to(red_cap, sub))
        red_tile = red if red <= red_cap else red_cap
    else:
        # Post must be tiled; minimal reduction tile, post tile fills the budget.
        post_tile = _round_down_to(in_budget // (2 * sub * itemsize), 128)
        red_tile = red if red <= sub else sub

    red_blocks = pl.cdiv(red, red_tile)
    grid = (pre, pl.cdiv(post, post_tile), red_blocks)
    kernel = functools.partial(
        _max_middle_axis_kernel,
        red_rem=red % red_tile,
        single_step=(red_blocks == 1),
        neg=neg,
    )

    out = pl.pallas_call(
        kernel,
        out_shape=jax.ShapeDtypeStruct((pre, 1, post), x3.dtype),
        grid=grid,
        in_specs=[pl.BlockSpec((None, red_tile, post_tile), lambda p, j, k: (p, k, j))],
        out_specs=pl.BlockSpec((None, 1, post_tile), lambda p, j, k: (p, 0, j)),
        compiler_params=pltpu.CompilerParams(
            dimension_semantics=("parallel", "parallel", "arbitrary"),
            vmem_limit_bytes=vmem_limit,
        ),
    )(x3)
    return out[:, 0, :]


# --------------------------------------------------------------------------------------
# Public wrapper: torch.max(tensor, dim=dim_to_reduce).values
# --------------------------------------------------------------------------------------
def max_pool_1d(x: jax.Array, dim_to_reduce: int = 2, *, vmem_budget_bytes=None) -> jax.Array:
    """Equivalent of torch.max(tensor, dim=dim_to_reduce).values.

    `vmem_budget_bytes` overrides the per-buffer VMEM budget (testing/tuning only).
    """
    ndim = x.ndim
    d = dim_to_reduce % ndim
    out_shape = x.shape[:d] + x.shape[d + 1:]

    pre = math.prod(x.shape[:d])
    red = x.shape[d]
    post = math.prod(x.shape[d + 1:])

    in_budget, vmem_limit = _vmem_budgets()
    if vmem_budget_bytes is not None:
        in_budget = int(vmem_budget_bytes)

    if post == 1:
        # Reduced axis is trailing (module default dim=2 on (B, C, L)): free reshape,
        # lane-axis reduce, no transpose materialized.
        res = _max_reduce_last_axis(x.reshape(pre, red), in_budget, vmem_limit)
    else:
        # Non-trailing axis: keep the layout and reduce over the sublane axis instead
        # of transposing (avoids an extra full HBM pass on a memory-bound op).
        res = _max_reduce_middle_axis(x.reshape(pre, red, post), in_budget, vmem_limit)

    return res.reshape(out_shape)


if __name__ == "__main__":
    key = jax.random.PRNGKey(0)
    k1, k2, k3 = jax.random.split(key, 3)

    # Module-default small shape: (batch=2, channels=4, length=16), dim=2.
    B, C, L = 2, 4, 16
    x = jax.random.normal(k1, (B, C, L), dtype=jnp.float32)

    out = jax.block_until_ready(max_pool_1d(x, dim_to_reduce=2))
    ref = jnp.max(x, axis=2)
    assert out.shape == ref.shape == (B, C), (out.shape, ref.shape)
    assert jnp.allclose(out, ref), "Pallas max-pool (dim=2) mismatch"

    # Non-trailing reduction axis (sublane-reduce kernel, lane-dense output).
    out1 = jax.block_until_ready(max_pool_1d(x, dim_to_reduce=1))
    ref1 = jnp.max(x, axis=1)
    assert out1.shape == ref1.shape == (B, L), (out1.shape, ref1.shape)
    assert jnp.allclose(out1, ref1), "Pallas max-pool (dim=1) mismatch"

    # Integer dtype (INT_MIN identity / exact max).
    xi = jax.random.randint(k3, (B, C, L), -100, 100, dtype=jnp.int32)
    outi = jax.block_until_ready(max_pool_1d(xi, dim_to_reduce=2))
    assert jnp.array_equal(outi, jnp.max(xi, axis=2)), "Pallas max-pool (int32) mismatch"

    # Larger (still small) shape; default budgets -> single-reduction-step fast paths.
    xb = jax.random.normal(k2, (2, 20, 8320), dtype=jnp.float32)
    outb = jax.block_until_ready(max_pool_1d(xb, dim_to_reduce=2))
    assert jnp.allclose(outb, jnp.max(xb, axis=2)), "Pallas max-pool (big dim=2) mismatch"
    outb1 = jax.block_until_ready(max_pool_1d(xb, dim_to_reduce=1))
    assert jnp.allclose(outb1, jnp.max(xb, axis=1)), "Pallas max-pool (big dim=1) mismatch"

    # Tiny VMEM budget override: exercises the tiled-reduction grids, the revisited
    # output accumulator and the pl.when-gated tail masks at small shapes.
    small_budget = 256 * 1024
    outt = jax.block_until_ready(max_pool_1d(xb, dim_to_reduce=2, vmem_budget_bytes=small_budget))
    assert jnp.allclose(outt, jnp.max(xb, axis=2)), "Pallas max-pool (tiled dim=2) mismatch"
    outt1 = jax.block_until_ready(max_pool_1d(xb, dim_to_reduce=1, vmem_budget_bytes=small_budget))
    assert jnp.allclose(outt1, jnp.max(xb, axis=1)), "Pallas max-pool (tiled dim=1) mismatch"

    print("KERNEL_OK")
</pallas_src>

<mosaic_0001>
module attributes {stable_mosaic.version = 11 : i64} {
  func.func @_max_last_axis_kernel(%arg0: i32, %arg1: i32, %arg2: memref<8x16xf32, #tpu.memory_space<vmem>>, %arg3: memref<8x1xf32, #tpu.memory_space<vmem>>) attributes {dimension_semantics = [#tpu.dimension_semantics<parallel>, #tpu.dimension_semantics<arbitrary>], iteration_bounds = array<i64: 1, 1>, scalar_prefetch = 0 : i64, scratch_operands = 0 : i64, tpu.core_type = #tpu.core_type<tc>, window_params = [{transform_indices = @transform_0, window_bounds = array<i64: 8, 16>}, {transform_indices = @transform_1, window_bounds = array<i64: 8, 1>}]} {
    %c0 = arith.constant 0 : index
    %c0_0 = arith.constant 0 : index
    %0 = vector.load %arg2[%c0, %c0_0] : memref<8x16xf32, #tpu.memory_space<vmem>>, vector<8x16xf32>
    %cst = arith.constant dense<0xFF800000> : vector<8xf32>
    %1 = vector.multi_reduction <maximumf>, %0, %cst [1] : vector<8x16xf32> to vector<8xf32>
    %2 = vector.shape_cast %1 : vector<8xf32> to vector<8x1xf32>
    %c0_1 = arith.constant 0 : index
    %c0_2 = arith.constant 0 : index
    %3 = vector.load %arg3[%c0_1, %c0_2] : memref<8x1xf32, #tpu.memory_space<vmem>>, vector<8x1xf32>
    tpu.vector_store %arg3[%c0_1, %c0_2], %2 {strides = array<i32>} : memref<8x1xf32, #tpu.memory_space<vmem>>, vector<8x1xf32>,
    return
  }
  func.func @transform_0(%arg0: i32, %arg1: i32) -> (i32, i32) {
    %c0_i32 = arith.constant 0 : i32
    return %arg0, %arg1 : i32, i32
  }
  func.func @transform_1(%arg0: i32, %arg1: i32) -> (i32, i32) {
    %c0_i32 = arith.constant 0 : i32
    %c0_i32_0 = arith.constant 0 : i32
    return %arg0, %c0_i32 : i32, i32
  }
}

</mosaic_0001>

<bundles_post_ra>
// kernel: tpu_custom_call.1
= control target key start
LH: loop header
LB: loop body
LE: loop exit
PB: predicated region body
PF: predicated region fallthrough
CT: control target
= control target key end

     0   :  { %6 = vsyncpa [#allocation3], 0  ;;  %s55_s6 = smov [#allocation2]   ;;  %s72_s0 = inlined_call_operand.hbm [shape: f32[8,16], index: 0, kind: input, shape index: {}]   ;;  %s73_s1 = inlined_call_operand.vmem [shape: f32[8,1], index: 1, kind: output, shape index: {}]  }
   0x1   :  { %s13_s7 = sshll.u32 %s55_s6, 4  ;;  %s14_s7 = int_to_ptr.vmem [resolvable:$true] %s13_s7 }
   0x2   :  { %s41_s8 = scalar_lea.vmem %s14_s7, 128  ;;  %p46_p1 = scmp.lt.s32.totalorder %s14_s7, %s14_s7 }
   0x3   :  { %p42_p0 = scmp.ne.s32.totalorder %s14_s7, %s41_s8  ;;  %p47_p2 = scmp.lt.s32.totalorder %s41_s8, %s41_s8 }
   0x5   :  { %p48_p3 = por %p47_p2, %p46_p1 }
   0x7   :  { %p49_p4 = pnand %p48_p3, %p42_p0 }
   0x9   :  { %52 = shalt.err (!%p49_p4)
}
   0xa   :  { %16 = dma.hbm_to_vmem [thread:$0]  %s72_s0, 128, %s14_s7, [#allocation3]  }
   0xb   :  { %53 = dma.done.wait [#allocation3], 128  }
   0xc   :  { %54 = vsyncadd [#allocation3], 4294967168  ;;  %vm21_vm0 = vcmask 130048   ;;  %v20_v0 = vld [vmem:[#allocation2] sm:$0xff]  ;;  %vm25_vm1 = vcmask 7168  }
   0xd   :  { %v22_v1 = vsel %vm21_vm0, %v20_v0, -inf }
   0xe   :  { %23 = vmax.xlane.f32.xlu0 %v22_v1 }
  0x97   :  { %v24_v2 = vpop.xlane.xlu0 %23 }
  0x98   :  { %26 = vst.msk [vmem:[%s73_s1] sm:$0xff] %vm25_vm1, %v24_v2 }
  0x99   :  { %31 = vsyncpa [#allocation3], 1 }

</bundles_post_ra>
